<compile_context>
chip_gen: v6e
topology: v6e:2x2x1
jax: 0.10.0
libtpu: 0.0.40
codegen_flags: <defaults>
</compile_context>

<pallas_src>
import functools

import jax
import jax.numpy as jnp
from jax.experimental import pallas as pl
from jax.experimental.pallas import tpu as pltpu

# ----------------------------- configuration -------------------------------
B = 2            # batch
C = 8            # dim (== one sublane tile)
H = W = 16       # spatial
S = H * W        # flattened spatial (lane axis), 256 = 2 lane tiles
DW_SIZE = 7      # large depthwise kernel
SMALL_K = 3      # small depthwise kernel
POS_K = 3        # MLP positional depthwise kernel
MLP_RATIO = 4
HIDDEN = C * MLP_RATIO
EPS = 1e-6


# ------------------------- kernel-side math helpers -------------------------
# These operate on (channels, H*W) float32 slabs inside the Pallas kernel.

def _gelu(x):
    # exact GELU (erf), matches torch.nn.GELU(approximate='none')
    return 0.5 * x * (1.0 + jax.lax.erf(x * 0.7071067811865476))


def _layernorm_cs(x, w_col, b_col):
    # PyTorch "channels_first" LayerNorm on a (Cx, S) slab: per-pixel stats
    # over the channel (sublane) axis, biased variance, eps inside the sqrt.
    u = jnp.mean(x, axis=0, keepdims=True)
    d = x - u
    s = jnp.mean(d * d, axis=0, keepdims=True)
    return d * jax.lax.rsqrt(s + EPS) * w_col + b_col


def _dwconv_taps(x, w_taps, b_col, k, row_ids, col_ids, roll_sign):
    """Depthwise 'same' conv (stride 1, odd kernel) on a flattened (Cx, S) slab.

    w_taps: (Cx, k*k) with tap index t = kh*k + kw (cross-correlation like
    torch Conv2d).  Each spatial shift is a lane roll (XLU) combined with a
    precomputed border mask, so no padded copies or second-minor slices are
    materialized; the XLU work overlaps the VPU multiply-accumulates.
    """
    p = k // 2

    def border(ids, d, extent):
        if d == 0:
            return None
        return (ids < (extent - d)) if d > 0 else (ids >= (-d))

    row_ok = {dh: border(row_ids, dh, H) for dh in range(-p, p + 1)}
    col_ok = {dw: border(col_ids, dw, W) for dw in range(-p, p + 1)}

    out = None
    for kh in range(k):
        dh = kh - p
        rm = row_ok[dh]
        for kw in range(k):
            dw = kw - p
            cm = col_ok[dw]
            delta = dh * W + dw
            xs = x if delta == 0 else pltpu.roll(x, (roll_sign * delta) % S, axis=1)
            if rm is None:
                m = cm
            elif cm is None:
                m = rm
            else:
                m = jnp.logical_and(rm, cm)
            if m is not None:
                xs = jnp.where(m, xs, 0.0)
            t = kh * k + kw
            term = xs * w_taps[:, t:t + 1]
            out = term if out is None else out + term
    return out + b_col


# ------------------------------ Pallas kernel -------------------------------
def _block_kernel(x_ref, vc_ref, vh_ref, wav_ref, wproj_ref, wfc1_ref,
                  wfc2_ref, dww_ref, posw_ref, o_ref, *, roll_sign):
    x = x_ref[0]                               # (C, S) float32
    vc = vc_ref[...]                           # (C, 11) per-channel vectors
    vh = vh_ref[...]                           # (HIDDEN, 2)

    def col(t, i):                             # (Cx, 1) column, hoisted once
        return t[:, i:i + 1]

    ln1_w, ln1_b = col(vc, 0), col(vc, 1)
    a_b, dw_b = col(vc, 2), col(vc, 3)
    v_b, proj_b = col(vc, 4), col(vc, 5)
    ln2_w, ln2_b = col(vc, 6), col(vc, 7)
    fc2_b = col(vc, 8)
    ls1, ls2 = col(vc, 9), col(vc, 10)
    fc1_b, pos_b = col(vh, 0), col(vh, 1)

    # Pixel coordinates along the lane axis, computed once and reused by both
    # depthwise convs (W, H are powers of two -> shifts / ands).
    flat = jax.lax.broadcasted_iota(jnp.int32, (1, S), 1)
    row_ids = flat // W
    col_ids = flat % W

    # ---------------- attn (ConvMod) branch ----------------
    xn = _layernorm_cs(x, ln1_w, ln1_b)
    # fused a/v 1x1 convs: one (2C, C) x (C, S) matmul instead of two
    av = jnp.dot(wav_ref[...], xn, preferred_element_type=jnp.float32)
    a = _gelu(av[:C, :] + a_b)
    v = av[C:, :] + v_b
    a = _dwconv_taps(a, dww_ref[...], dw_b, DW_SIZE, row_ids, col_ids, roll_sign)
    attn = jnp.dot(wproj_ref[...], a * v,
                   preferred_element_type=jnp.float32) + proj_b
    x = x + ls1 * attn

    # ---------------------- MLP branch ----------------------
    yn = _layernorm_cs(x, ln2_w, ln2_b)
    h = _gelu(jnp.dot(wfc1_ref[...], yn,
                      preferred_element_type=jnp.float32) + fc1_b)
    h = h + _gelu(_dwconv_taps(h, posw_ref[...], pos_b, POS_K,
                               row_ids, col_ids, roll_sign))
    mlp = jnp.dot(wfc2_ref[...], h,
                  preferred_element_type=jnp.float32) + fc2_b
    o_ref[0] = (x + ls2 * mlp).astype(o_ref.dtype)


# ---------------------- one-time roll-direction probe -----------------------
_ROLL_SIGN = None


def _get_roll_sign():
    """Probe pltpu.roll's rotation direction once so the depthwise taps can
    never silently use the wrong shift sign.  One (8,128) rotate, run once."""
    global _ROLL_SIGN
    if _ROLL_SIGN is None:
        def probe(x_ref, o_ref):
            o_ref[...] = pltpu.roll(x_ref[...], 1, axis=1)

        xi = jax.lax.broadcasted_iota(jnp.float32, (8, 128), 1)
        y = pl.pallas_call(
            probe, out_shape=jax.ShapeDtypeStruct((8, 128), jnp.float32))(xi)
        # jnp.roll semantics (expected): out[i] = x[i-1] -> out[0] == 127.
        _ROLL_SIGN = 1 if float(y[0, 0]) == 1.0 else -1
    return _ROLL_SIGN


# --------------------------- parameter packing ------------------------------
def _pack_params(params):
    """Pack the 22 module parameters into 8 kernel inputs, all 2-D and laid
    out for the (channels-on-sublanes, spatial-on-lanes) kernel layout."""
    f32 = jnp.float32
    vec_c = jnp.concatenate([
        params["ln1_w"], params["ln1_b"],
        params["a0_b"], params["dwL_b"] + params["dwS_b"],
        params["v_b"], params["proj_b"],
        params["ln2_w"], params["ln2_b"],
        params["fc2_b"], params["ls1"], params["ls2"],
    ], axis=0).T.astype(f32)                                        # (C, 11)
    vec_h = jnp.concatenate(
        [params["fc1_b"], params["pos_b"]], axis=0).T.astype(f32)   # (HIDDEN, 2)

    w_av = jnp.concatenate(
        [params["a0_w"].T, params["v_w"].T], axis=0).astype(f32)    # (2C, C)
    w_proj = params["proj_w"].T.astype(f32)                         # (C, C)
    w_fc1 = params["fc1_w"].T.astype(f32)                           # (HIDDEN, C)
    w_fc2 = params["fc2_w"].T.astype(f32)                           # (C, HIDDEN)

    # Re-parameterize the ReparamLargeKernelConv exactly like merge_kernel():
    # pad the 3x3 small kernel into the 7x7 one and add (biases were summed
    # into vec_c above).  49 taps in the kernel instead of 58.
    pad = (DW_SIZE - SMALL_K) // 2
    dw_merged = params["dwL_w"] + jnp.pad(
        params["dwS_w"], ((pad, pad), (pad, pad), (0, 0)))
    dw_w = dw_merged.reshape(DW_SIZE * DW_SIZE, C).T.astype(f32)    # (C, 49)
    pos_w = params["pos_w"].reshape(POS_K * POS_K, HIDDEN).T.astype(f32)  # (HIDDEN, 9)

    return [vec_c, vec_h, w_av, w_proj, w_fc1, w_fc2, dw_w, pos_w]


# ------------------------------ forward wrapper ------------------------------
def block_forward(x_nchw, params):
    """x_nchw: (B, C, H, W) float32 (PyTorch layout); returns the same layout."""
    x = x_nchw.reshape(B, C, S)          # NCHW flattened: no transposes needed
    packed = _pack_params(params)

    kernel = functools.partial(_block_kernel, roll_sign=_get_roll_sign())

    x_spec = pl.BlockSpec((1, C, S), lambda b: (b, 0, 0))
    in_specs = [x_spec] + [pl.BlockSpec(p.shape, lambda b: (0, 0))
                           for p in packed]

    out = pl.pallas_call(
        kernel,
        out_shape=jax.ShapeDtypeStruct((B, C, S), jnp.float32),
        grid=(B,),
        in_specs=in_specs,
        out_specs=x_spec,
        # One image per grid step: on v7x the two steps shard across the two
        # TensorCores; on v5e/v6e the second step costs only pipeline overhead.
        compiler_params=pltpu.CompilerParams(
            dimension_semantics=("parallel",)),
    )(x, *packed)

    return out.reshape(B, C, H, W)


# ------------------------- deterministic parameters -------------------------
def make_params(key):
    keys = jax.random.split(key, 16)

    def w(k, shape, scale=0.1):
        return (scale * jax.random.normal(k, shape)).astype(jnp.float32)

    params = {
        # LayerNorms: init as in the module (ones / zeros)
        "ln1_w": jnp.ones((1, C), jnp.float32),
        "ln1_b": jnp.zeros((1, C), jnp.float32),
        "ln2_w": jnp.ones((1, C), jnp.float32),
        "ln2_b": jnp.zeros((1, C), jnp.float32),
        # ConvMod.a[0]: 1x1 conv (weight stored as (Cin, Cout))
        "a0_w": w(keys[0], (C, C)),
        "a0_b": w(keys[1], (1, C)),
        # ReparamLargeKernelConv: large + small depthwise convs, (K, K, C)
        "dwL_w": w(keys[2], (DW_SIZE, DW_SIZE, C)),
        "dwL_b": w(keys[3], (1, C)),
        "dwS_w": w(keys[4], (SMALL_K, SMALL_K, C)),
        "dwS_b": w(keys[5], (1, C)),
        # ConvMod.v / ConvMod.proj: 1x1 convs
        "v_w": w(keys[6], (C, C)),
        "v_b": w(keys[7], (1, C)),
        "proj_w": w(keys[8], (C, C)),
        "proj_b": w(keys[9], (1, C)),
        # MLP
        "fc1_w": w(keys[10], (C, HIDDEN)),
        "fc1_b": w(keys[11], (1, HIDDEN)),
        "pos_w": w(keys[12], (POS_K, POS_K, HIDDEN)),
        "pos_b": w(keys[13], (1, HIDDEN)),
        "fc2_w": w(keys[14], (HIDDEN, C)),
        "fc2_b": w(keys[15], (1, C)),
        # layer scales, init 1e-6 * ones(dim) as in the module
        "ls1": (1e-6 * jnp.ones((1, C))).astype(jnp.float32),
        "ls2": (1e-6 * jnp.ones((1, C))).astype(jnp.float32),
    }
    return params


# --------------------- pure-JAX reference (independent path) -----------------
def _layernorm_cf_ref(x, w, b):
    u = jnp.mean(x, axis=-1, keepdims=True)
    s = jnp.mean((x - u) * (x - u), axis=-1, keepdims=True)
    xn = (x - u) / jnp.sqrt(s + EPS)
    return xn * w.reshape(1, 1, -1) + b.reshape(1, 1, -1)


def _conv1x1_ref(x, w, b):
    h, ww, cin = x.shape
    cout = w.shape[1]
    y = jnp.dot(x.reshape(h * ww, cin), w, preferred_element_type=jnp.float32) + b
    return y.reshape(h, ww, cout)


def _dwconv_ref(x, w, b):
    h, ww, c = x.shape
    k = w.shape[0]
    p = k // 2
    xp = x
    if p > 0:
        zr = jnp.zeros((p, ww, c), x.dtype)
        xp = jnp.concatenate([zr, xp, zr], axis=0)
        zc = jnp.zeros((h + 2 * p, p, c), x.dtype)
        xp = jnp.concatenate([zc, xp, zc], axis=1)
    out = jnp.zeros((h, ww, c), jnp.float32)
    for kh in range(k):
        for kw in range(k):
            out = out + xp[kh:kh + h, kw:kw + ww, :] * w[kh, kw]
    return out + b.reshape(1, 1, -1)


def _block_math_ref(x, p):
    xn = _layernorm_cf_ref(x, p["ln1_w"], p["ln1_b"])
    a = _gelu(_conv1x1_ref(xn, p["a0_w"], p["a0_b"]))
    a = _dwconv_ref(a, p["dwL_w"], p["dwL_b"]) + _dwconv_ref(a, p["dwS_w"], p["dwS_b"])
    v = _conv1x1_ref(xn, p["v_w"], p["v_b"])
    attn = _conv1x1_ref(a * v, p["proj_w"], p["proj_b"])
    x = x + p["ls1"].reshape(1, 1, -1) * attn

    yn = _layernorm_cf_ref(x, p["ln2_w"], p["ln2_b"])
    h = _gelu(_conv1x1_ref(yn, p["fc1_w"], p["fc1_b"]))
    h = h + _gelu(_dwconv_ref(h, p["pos_w"], p["pos_b"]))
    mlp_out = _conv1x1_ref(h, p["fc2_w"], p["fc2_b"])
    x = x + p["ls2"].reshape(1, 1, -1) * mlp_out
    return x


def block_reference(x_nchw, params):
    x = jnp.transpose(x_nchw, (0, 2, 3, 1))
    fn = functools.partial(_block_math_ref, p=params)
    out = jax.vmap(lambda xi: fn(xi))(x)
    return jnp.transpose(out, (0, 3, 1, 2))


# ----------------------------------- main -----------------------------------
if __name__ == "__main__":
    key = jax.random.PRNGKey(0)
    k_x, k_p = jax.random.split(key)
    x = jax.random.normal(k_x, (B, C, H, W), jnp.float32)   # NCHW like PyTorch
    params = make_params(k_p)

    out = jax.block_until_ready(block_forward(x, params))
    ref = jax.block_until_ready(block_reference(x, params))

    assert out.shape == (B, C, H, W)
    assert jnp.allclose(out, ref, rtol=1e-4, atol=1e-5), (
        float(jnp.max(jnp.abs(out - ref))))

    print("KERNEL_OK")
</pallas_src>

<mosaic_0001>
module attributes {stable_mosaic.version = 11 : i64} {
  func.func @probe(%arg0: memref<8x128xf32, #tpu.memory_space<vmem>>, %arg1: memref<8x128xf32, #tpu.memory_space<vmem>>) attributes {dimension_semantics = [], scalar_prefetch = 0 : i64, scratch_operands = 0 : i64, tpu.core_type = #tpu.core_type<tc>} {
    %c0 = arith.constant 0 : index
    %c0_0 = arith.constant 0 : index
    %0 = vector.load %arg0[%c0, %c0_0] : memref<8x128xf32, #tpu.memory_space<vmem>>, vector<8x128xf32>
    %c1_i32 = arith.constant 1 : i32
    %1 = tpu.dynamic_rotate %0 by %c1_i32 dim 1 : vector<8x128xf32>, i32 -> vector<8x128xf32>
    %c0_1 = arith.constant 0 : index
    %c0_2 = arith.constant 0 : index
    %2 = vector.load %arg1[%c0_1, %c0_2] : memref<8x128xf32, #tpu.memory_space<vmem>>, vector<8x128xf32>
    tpu.vector_store %arg1[%c0_1, %c0_2], %1 {strides = array<i32>} : memref<8x128xf32, #tpu.memory_space<vmem>>, vector<8x128xf32>,
    return
  }
}

</mosaic_0001>

<bundles_post_ra>
// kernel: tpu_custom_call.1
= control target key start
LH: loop header
LB: loop body
LE: loop exit
PB: predicated region body
PF: predicated region fallthrough
CT: control target
= control target key end

     0   :  { %6 = vsyncpa [#allocation3], 0  ;;  %s106_s0 = inlined_call_operand.hbm [shape: f32[8,128], index: 0, kind: input, shape index: {}]   ;;  %s107_s1 = inlined_call_operand.hbm [shape: f32[8,128], index: 1, kind: output, shape index: {}]  }
   0x1   :  { %7 = vsyncpa [#allocation4], 0  ;;  %s87_s6 = smov [#allocation2]  }
   0x2   :  { %s14_s7 = sshll.u32 %s87_s6, 4  ;;  %s15_s7 = int_to_ptr.vmem [resolvable:$true] %s14_s7 }
   0x3   :  { %s51_s8 = scalar_lea.vmem %s15_s7, 128  ;;  %p56_p1 = scmp.lt.s32.totalorder %s15_s7, %s15_s7 }
   0x4   :  { %p52_p0 = scmp.ne.s32.totalorder %s15_s7, %s51_s8  ;;  %p57_p2 = scmp.lt.s32.totalorder %s51_s8, %s51_s8 }
   0x6   :  { %p58_p3 = por %p57_p2, %p56_p1 }
   0x8   :  { %p59_p4 = pnand %p58_p3, %p52_p0 }
   0xa   :  { %62 = shalt.err (!%p59_p4)
}
   0xb   :  { %17 = dma.hbm_to_vmem [thread:$0]  %s106_s0, 128, %s15_s7, [#allocation3]  }
   0xc   :  { %83 = dma.done.wait [#allocation3], 128  }
   0xd   :  { %84 = vsyncadd [#allocation3], 4294967168  ;;  %v21_v0 = vld [vmem:[#allocation2] sm:$0xff]  ;;  %s88_s11 = smov 1   ;;  %s89_s12 = smov [#allocation5]  }
   0xe   :  { %22 = vrot.lane.b32.xlu0 %v21_v0, %s88_s11  ;;  %s31_s13 = sshll.u32 %s89_s12, 4  ;;  %s32_s13 = int_to_ptr.vmem [resolvable:$true] %s31_s13 }
   0xf   :  { %s63_s14 = scalar_lea.vmem %s32_s13, 128  ;;  %p68_p6 = scmp.lt.s32.totalorder %s32_s13, %s32_s13 }
  0x10   :  { %p64_p5 = scmp.ne.s32.totalorder %s32_s13, %s63_s14  ;;  %p69_p7 = scmp.lt.s32.totalorder %s63_s14, %s63_s14 }
  0x12   :  { %p70_p8 = por %p69_p7, %p68_p6 }
  0x14   :  { %p71_p9 = pnand %p70_p8, %p64_p5 }
  0x80   :  { %v23_v1 = vpop.permute.xlu0 %22 }
  0x81   :  { %24 = vst [vmem:[#allocation5] sm:$0xff] %v23_v1 }
  0x82   :  { %74 = shalt.err (!%p71_p9)
}
  0x83   :  { %34 = dma.vmem_to_hbm [thread:$0]  %s32_s13, 128, %s107_s1, [#allocation4]  }
  0x84   :  { %85 = dma.done.wait [#allocation4], 128  }
  0x85   :  { %86 = vsyncadd [#allocation4], 4294967168 }
  0x86   :  { %38 = vsyncpa [#allocation3], 1 }
  0x87   :  { %39 = vsyncpa [#allocation4], 1 }

</bundles_post_ra>
